<compile_context>
chip_gen: v5e
topology: v5e:2x2
jax: 0.10.0
libtpu: 0.0.40
codegen_flags: <defaults>
</compile_context>

<pallas_src>
import jax
import jax.numpy as jnp
from jax.experimental import pallas as pl
from jax.experimental.pallas import tpu as pltpu

# Target bytes per grid step per array (~0.5–2 MiB sweet spot for streaming ops).
_TARGET_TILE_BYTES = 2 * 1024 * 1024


def _normalization_kernel(mean_ref, inv_std_ref, img_ref, out_ref):
    """out = (img - mean[c]) * inv_std[c] for one (1, 1, th, W) tile."""
    c = pl.program_id(1)                   # channel index of this tile
    m = mean_ref[c]                        # scalar loads from SMEM
    s = inv_std_ref[c]
    x = img_ref[...].astype(jnp.float32)   # in-register cast (free on VPU)
    out_ref[...] = ((x - m) * s).astype(out_ref.dtype)


def _choose_row_tile(h, w, itemsize):
    """Largest multiple-of-8 row count whose (th, W) tile is <= ~2 MiB."""
    if h * w * itemsize <= _TARGET_TILE_BYTES or h <= 8:
        return h                           # whole plane fits: block == full dims
    th = (_TARGET_TILE_BYTES // (w * itemsize)) // 8 * 8
    return int(max(8, min(h, th)))


def normalize_pallas(img, mean_flat, inv_std_flat):
    """Per-channel normalization of a CHW or NCHW image via a Pallas kernel."""
    orig_shape = img.shape
    if img.ndim == 3:
        img4 = img[None]                   # (1, C, H, W) — free reshape
    elif img.ndim == 4:
        img4 = img
    else:
        raise ValueError(f"expected CHW or NCHW input, got shape {orig_shape}")

    n, c, h, w = img4.shape
    assert mean_flat.shape == (c,) and inv_std_flat.shape == (c,)

    th = _choose_row_tile(h, w, img4.dtype.itemsize)
    grid = (n, c, pl.cdiv(h, th))

    out = pl.pallas_call(
        _normalization_kernel,
        out_shape=jax.ShapeDtypeStruct((n, c, h, w), img4.dtype),
        grid_spec=pltpu.PrefetchScalarGridSpec(
            num_scalar_prefetch=0,
            grid=grid,
            in_specs=[
                # Tiny per-channel tables live in SMEM (no per-step DMA).
                pl.BlockSpec(memory_space=pltpu.MemorySpace.SMEM),
                pl.BlockSpec(memory_space=pltpu.MemorySpace.SMEM),
                # One (1, 1, th, W) slab of the image per grid step.
                pl.BlockSpec((1, 1, th, w), lambda ni, ci, ri: (ni, ci, ri, 0)),
            ],
            out_specs=pl.BlockSpec((1, 1, th, w), lambda ni, ci, ri: (ni, ci, ri, 0)),
        ),
        compiler_params=pltpu.CompilerParams(
            # Pure elementwise op: every axis is parallel (lets v7x use both TCs).
            dimension_semantics=("parallel", "parallel", "parallel"),
        ),
    )(mean_flat, inv_std_flat, img4)

    return out.reshape(orig_shape)


class Normalization:
    """JAX/Pallas analogue of the PyTorch Normalization module."""

    def __init__(self, mean, std):
        mean = jnp.asarray(mean, dtype=jnp.float32).reshape(-1)
        std = jnp.asarray(std, dtype=jnp.float32).reshape(-1)
        # Mirror the PyTorch attributes (.view(-1, 1, 1)).
        self.mean = mean.reshape(-1, 1, 1)
        self.std = std.reshape(-1, 1, 1)
        # Hoisted out of the hot path: flat tables + reciprocal computed once.
        self._mean_flat = mean
        self._inv_std_flat = (1.0 / std).astype(jnp.float32)

    def __call__(self, img):
        return normalize_pallas(img, self._mean_flat, self._inv_std_flat)


if __name__ == "__main__":
    key = jax.random.PRNGKey(0)

    # Small NCHW image batch: batch=2, channels=3 (RGB), spatial=16x16.
    img = jax.random.uniform(key, (2, 3, 16, 16), dtype=jnp.float32)
    mean = [0.485, 0.456, 0.406]
    std = [0.229, 0.224, 0.225]

    module = Normalization(mean, std)
    out = jax.block_until_ready(module(img))

    # Reference: (img - mean.view(-1,1,1)) / std.view(-1,1,1) with broadcasting.
    mean_b = jnp.asarray(mean, jnp.float32).reshape(1, -1, 1, 1)
    std_b = jnp.asarray(std, jnp.float32).reshape(1, -1, 1, 1)
    ref = (img - mean_b) / std_b

    assert out.shape == img.shape and out.dtype == img.dtype
    assert jnp.allclose(out, ref, rtol=1e-5, atol=1e-6), float(
        jnp.max(jnp.abs(out - ref)))

    print("KERNEL_OK")
</pallas_src>

<mosaic_0001>
module attributes {stable_mosaic.version = 11 : i64} {
  func.func @_normalization_kernel(%arg0: i32, %arg1: i32, %arg2: i32, %arg3: memref<3xf32, #tpu.memory_space<smem>>, %arg4: memref<3xf32, #tpu.memory_space<smem>>, %arg5: memref<1x1x16x16xf32, #tpu.memory_space<vmem>>, %arg6: memref<1x1x16x16xf32, #tpu.memory_space<vmem>>) attributes {dimension_semantics = [#tpu.dimension_semantics<parallel>, #tpu.dimension_semantics<parallel>, #tpu.dimension_semantics<parallel>], iteration_bounds = array<i64: 2, 3, 1>, scalar_prefetch = 0 : i64, scratch_operands = 0 : i64, tpu.core_type = #tpu.core_type<tc>, window_params = [{transform_indices = @transform_0, window_bounds = array<i64: 3>}, {transform_indices = @transform_1, window_bounds = array<i64: 3>}, {transform_indices = @transform_2, window_bounds = array<i64: 1, 1, 16, 16>}, {transform_indices = @transform_3, window_bounds = array<i64: 1, 1, 16, 16>}]} {
    %0 = arith.index_cast %arg1 : i32 to index
    %1 = memref.load %arg3[%0] : memref<3xf32, #tpu.memory_space<smem>>
    %2 = arith.index_cast %arg1 : i32 to index
    %3 = memref.load %arg4[%2] : memref<3xf32, #tpu.memory_space<smem>>
    %c0 = arith.constant 0 : index
    %c0_0 = arith.constant 0 : index
    %c0_1 = arith.constant 0 : index
    %c0_2 = arith.constant 0 : index
    %4 = vector.load %arg5[%c0, %c0_0, %c0_1, %c0_2] : memref<1x1x16x16xf32, #tpu.memory_space<vmem>>, vector<1x1x16x16xf32>
    %5 = vector.broadcast %1 : f32 to vector<1x1x16x16xf32>
    %6 = arith.subf %4, %5 : vector<1x1x16x16xf32>
    %7 = vector.broadcast %3 : f32 to vector<1x1x16x16xf32>
    %8 = arith.mulf %6, %7 : vector<1x1x16x16xf32>
    %c0_3 = arith.constant 0 : index
    %c0_4 = arith.constant 0 : index
    %c0_5 = arith.constant 0 : index
    %c0_6 = arith.constant 0 : index
    %9 = vector.load %arg6[%c0_3, %c0_4, %c0_5, %c0_6] : memref<1x1x16x16xf32, #tpu.memory_space<vmem>>, vector<1x1x16x16xf32>
    tpu.vector_store %arg6[%c0_3, %c0_4, %c0_5, %c0_6], %8 {strides = array<i32>} : memref<1x1x16x16xf32, #tpu.memory_space<vmem>>, vector<1x1x16x16xf32>,
    return
  }
  func.func @transform_0(%arg0: i32, %arg1: i32, %arg2: i32) -> i32 {
    %c0_i32 = arith.constant 0 : i32
    %c0_i32_0 = arith.constant 0 : i32
    return %c0_i32 : i32
  }
  func.func @transform_1(%arg0: i32, %arg1: i32, %arg2: i32) -> i32 {
    %c0_i32 = arith.constant 0 : i32
    %c0_i32_0 = arith.constant 0 : i32
    return %c0_i32 : i32
  }
  func.func @transform_2(%arg0: i32, %arg1: i32, %arg2: i32) -> (i32, i32, i32, i32) {
    %c0_i32 = arith.constant 0 : i32
    %c0_i32_0 = arith.constant 0 : i32
    return %arg0, %arg1, %arg2, %c0_i32 : i32, i32, i32, i32
  }
  func.func @transform_3(%arg0: i32, %arg1: i32, %arg2: i32) -> (i32, i32, i32, i32) {
    %c0_i32 = arith.constant 0 : i32
    %c0_i32_0 = arith.constant 0 : i32
    return %arg0, %arg1, %arg2, %c0_i32 : i32, i32, i32, i32
  }
}

</mosaic_0001>

<bundles_post_ra>
// kernel: tpu_custom_call.1
= control target key start
LH: loop header
LB: loop body
LE: loop exit
PB: predicated region body
PF: predicated region fallthrough
CT: control target
= control target key end

     0   :  { %s903_s0 = inlined_call_operand.hbm [shape: f32[3], index: 0, kind: input, shape index: {}]   ;;  %s904_s1 = inlined_call_operand.hbm [shape: f32[3], index: 1, kind: input, shape index: {}]   ;;  %s905_s2 = inlined_call_operand.hbm [shape: f32[2,3,16,16], index: 2, kind: input, shape index: {}]   ;;  %s906_s3 = inlined_call_operand.hbm [shape: f32[2,3,16,16], index: 3, kind: output, shape index: {}]  }
   0x1   :  { %913 = sst [smem:[#allocation19_spill]] %s903_s0 }
   0x2   :  { %914 = sst [smem:[#allocation20_spill]] %s904_s1 }
   0x3   :  { %8 = vsyncpa [#allocation5], 0 }
   0x4   :  { %9 = vsyncpa [#allocation7], 0 }
   0x5   :  { %10 = vsyncpa [#allocation3], 0 }
   0x6   :  { %12 = vsyncpa [#allocation3 + $0x1], 0 }
   0x7   :  { %13 = vsyncpa [#allocation4], 0 }
   0x8   :  { %15 = vsyncpa [#allocation4 + $0x1], 0  ;;  %s721_s12 = smov 0   ;;  %s723_s13 = smov 0  }
   0x9   :  { %s725_s14 = smov 0   ;;  %s727_s15 = smov 0  }
   0xa   :  { %s729_s16 = smov 0   ;;  %s731_s17 = smov 0  }
   0xb   :  { %s733_s18 = smov 0   ;;  %s735_s19 = smov 0  }
   0xc LB: > { %915 = sst [smem:[#allocation14_spill]] %s665_s12  ;;  %s403_s20 = sadd.s32 4294967295, %s693_s19   ;;  %s693_s19 = sphi %s735_s19, %s21_s19   ;;  %s689_s18 = sphi %s733_s18, %s940_s18   ;;  %s685_s17 = sphi %s731_s17, %s935_s17   ;;  %s681_s16 = sphi %s729_s16, %s939_s16   ;;  %s677_s15 = sphi %s727_s15, %s934_s15   ;;  %s673_s14 = sphi %s725_s14, %s938_s14   ;;  %s669_s13 = sphi %s723_s13, %s937_s13   ;;  %s665_s12 = sphi %s721_s12, %s936_s12  }
   0xd   : > { %916 = sst [smem:[#allocation15_spill]] %s685_s17  ;;  %s404_s21 = sadd.s32 4294967294, %s693_s19  }
   0xe   : > { %917 = sst [smem:[#allocation16_spill]] %s693_s19  ;;  %p100_p0 = scmp.ne.s32.totalorder %s673_s14, %s669_s13 }
   0xf   : > { %p101_p1 = scmp.eq.s32.totalorder %s693_s19, 0  ;;  %p106_p2 = scmp.ne.s32.totalorder %s669_s13, %s665_s12 }
  0x10   : > { %p769_p3 = scmp.eq.s32.totalorder %s403_s20, 0  ;;  %p134_p4 = scmp.eq.s32.totalorder %s403_s20, 5 }
  0x11   : > { %p773_p5 = por %p101_p1, %p100_p0  ;;  %p140_p6 = scmp.eq.s32.totalorder %s404_s21, 5 }
  0x12   : > { %p779_p7 = por %p769_p3, %p106_p2  ;;  %p783_p8 = por %p134_p4, %p100_p0 }
  0x13   : > { %p787_p9 = por %p140_p6, %p106_p2  ;;  %p405_p10 = scmp.ge.s32.totalorder %s693_s19, 1 }
  0x14   : > { %p147_p11 = scmp.lt.s32.totalorder %s693_s19, 7  ;;  %s924_s0 = sld [smem:[#allocation19_spill]] }
  0x15   : > { %s922_s27 = scalar_select %p787_p9, 1, 0 }
  0x16   : > { %p796_p12 = pnand %p405_p10, %p147_p11  ;;  %p453_p13 = scmp.lt.s32.totalorder %s693_s19, 6 }
  0x17   : > { %923 = sst [smem:[#allocation17_spill]] %s922_s27  ;;  %s695_s9 = smov [#allocation2]  }
  0x18   : > { %p436_p0 = pneg %p796_p12  ;;  %s926_s1 = sld [smem:[#allocation20_spill]] }
  0x19   : > { %p808_p1 = pnand %p453_p13, %p773_p5  ;;  %s696_s10 = smov [#allocation6]  }
  0x1a   : > { %s159_s30 = sshll.u32 %s924_s0, 4  ;;  %p437_p2 = pnand %p436_p0, %p769_p3  ;;  %s160_s30 = int_to_ptr.hbm [resolvable:$true] %s159_s30 }
  0x1b   : > { %s36_s11 = sadd.s32 1, %s685_s17  ;;  %s40_s20 = sadd.s32 1, %s689_s18 }
  0x1c   : > { %439 = dma.hbm_to_smem (!%p437_p2), %s160_s30, 16, %s695_s9, [#allocation5]  }
  0x1d   : > { %p38_p4 = scmp.ge.s32.totalorder %s36_s11, 3  ;;  %s180_s21 = sand.u32 1, %s673_s14  }
  0x1e   : > { %s169_s7 = sshll.u32 %s926_s1, 4  ;;  %s409_s28 = sshll.u32 %s180_s21, 4  ;;  %s170_s7 = int_to_ptr.hbm [resolvable:$true] %s169_s7 }
  0x1f   : > { %442 = dma.hbm_to_smem (!%p437_p2), %s170_s7, 16, %s696_s10, [#allocation7]  }
  0x20   : > { %s942_s11 = smov (%p38_p4, %s36_s11), 0  ;;  %s944_s20 = smov (!%p38_p4, %s40_s20), %s689_s18 }
  0x21   : > { %928 = sst [smem:[#allocation18_spill]] %s942_s11  ;;  %s87_s24 = ssub.s32 %s685_s17, %s942_s11 }
  0x22   : > { %p42_p5 = scmp.ge.s32.totalorder %s944_s20, 2  ;;  %s410_s29 = sshll.u32 %s685_s17, 1 }
  0x23   : > { %s422_s5 = smul.u32 6, %s689_s18  ;;  %s184_s6 = scalar_lea.vmem [#allocation8], %s409_s28 }
  0x24   : > { %s196_s30 = sshll.u32 %s184_s6, 4  ;;  %s946_s20 = smov (%p42_p5, %s944_s20), 0  ;;  %s197_s30 = int_to_ptr.vmem [resolvable:$true] %s196_s30 }
  0x25   : > { %s191_s7 = sadd.s32 %s422_s5, %s410_s29  ;;  %s86_s9 = ssub.s32 %s689_s18, %s946_s20 }
  0x26   : > { %s411_s10 = sshll.u32 %s191_s7, 3  ;;  %s88_s22 = sor.u32 %s87_s24, %s86_s9 }
  0x27   : > { %s193_s11 = scalar_lea.hbm %s905_s2, %s411_s10  ;;  %p91_p6 = scmp.eq.s32.totalorder %s88_s22, 0 }
  0x28   : > { %s194_s27 = sshll.u32 %s193_s11, 4  ;;  %s929_s17 = sadd.s32 1, %s673_s14  ;;  %s195_s27 = int_to_ptr.hbm [resolvable:$true] %s194_s27 }
  0x29   : > { %s834_s12 = scalar_select %p91_p6, %s673_s14, %s929_s17  }
  0x2a   : > { %s181_s28 = scalar_lea.sflag [#allocation3], %s180_s21  ;;  %s697_s6 = smov 128  }
  0x2b   : > { %s698_s19 = smov 8   ;;  %208 = sbr.rel (%p796_p12) target bundleno = 77 (0x4d), region = 32 }
  0x2c   : > { %446 = dma.hbm_to_vmem [thread:$0]  (!%p808_p1), %s195_s27, 256, %s197_s30, %s181_s28, %s697_s6, %s697_s6, %s698_s19  }
  0x30   : > { %648 = dma.done.wait (%p769_p3), [#allocation5], 16  }
  0x31   : > { %650 = vsyncadd (%p769_p3), [#allocation5], 4294967280 }
  0x32   : > { %652 = dma.done.wait (%p769_p3), [#allocation7], 16  }
  0x33   : > { %654 = vsyncadd (%p769_p3), [#allocation7], 4294967280  ;;  %s849_s0 = sand.u32 1, %s669_s13  }
  0x34   : > { %s415_s1 = sshll.u32 %s849_s0, 4  ;;  %s221_s17 = scalar_lea.sflag [#allocation3], %s849_s0 }
  0x35   : > { %s224_s19 = scalar_lea.vmem [#allocation8], %s415_s1 }
  0x36   : > { %656 = dma.done.wait (%p779_p7), %s221_s17, 256  }
  0x37   : > { %658 = vsyncadd (%p779_p7), %s221_s17, 4294967040 }
  0x38   : > { %230 = sfence }
  0x39   : > { %s251_s22 = sld [smem:[#allocation2 + %s677_s15]]  ;;  %s418_s27 = sshll.u32 %s677_s15, 1  ;;  %v253_v0 = vld [vmem:[%s224_s19] sm:$0xff]  ;;  %v254_v1 = vld [vmem:[%s224_s19 + $0x8] sm:$0xff]  ;;  %vm261_vm0 = vcmask 130048  }
  0x3a   : > { %s252_s23 = sld [smem:[#allocation6 + %s677_s15]]  ;;  %s423_s4 = smul.u32 6, %s681_s16 }
  0x3b   : > { %s248_s8 = scalar_lea.vmem [#allocation9], %s415_s1  ;;  %s265_s16 = scalar_lea.sflag [#allocation4], %s849_s0 }
  0x3c   : > { %s281_s11 = sshll.u32 %s248_s8, 4  ;;  %s278_s21 = sadd.s32 %s423_s4, %s418_s27  ;;  %s282_s11 = int_to_ptr.vmem [resolvable:$true] %s281_s11 }
  0x3d   : > { %s419_s24 = sshll.u32 %s278_s21, 3  ;;  %s607_s28 = scalar_lea.hbm %s906_s3, 96 }
  0x3e   : > { %s280_s5 = scalar_lea.hbm %s906_s3, %s419_s24 }
  0x3f   : > { %v255_v2 = vstv %s251_s22  ;;  %s283_s15 = sshll.u32 %s280_s5, 4  ;;  %s284_s15 = int_to_ptr.hbm [resolvable:$true] %s283_s15 }
  0x40   : > { %v256_v3 = vsub.f32 %v253_v0, %v255_v2  ;;  %v258_v4 = vstv %s252_s23  ;;  %v257_v5 = vsub.f32 %v254_v1, %v255_v2  ;;  %s601_s30 = sshra.s32 %s284_s15, 4  ;;  %s602_s30 = int_to_ptr.hbm [resolvable:$true] %s601_s30 }
  0x41   : > { %s603_s7 = scalar_lea.hbm %s602_s30, 16  ;;  %p608_p11 = scmp.lt.s32.totalorder %s602_s30, %s906_s3 }
  0x42   : > { %v259_v6 = vmul.f32 %v258_v4, %v256_v3  ;;  %v260_v7 = vmul.f32 %v258_v4, %v257_v5  ;;  %p604_p3 = scmp.ne.s32.totalorder %s602_s30, %s603_s7  ;;  %p609_p12 = scmp.lt.s32.totalorder %s607_s28, %s603_s7 }
  0x44   : > { %262 = vst.msk [vmem:[%s248_s8] sm:$0xff] %vm261_vm0, %v259_v6  ;;  %p605_p7 = pnand %p604_p3, %p783_p8  ;;  %p610_p13 = por %p609_p12, %p608_p11 }
  0x45   : > { %263 = vst.msk [vmem:[%s248_s8 + $0x8] sm:$0xff] %vm261_vm0, %v260_v7 }
  0x46   : > { %p606_p10 = pneg %p605_p7 }
  0x48   : > { %p611_p0 = pnand %p610_p13, %p606_p10 }
  0x4a   : > { %614 = shalt.err (!%p611_p0)
}
  0x4b   : > { %s699_s0 = smov 128   ;;  %s700_s17 = smov 8  }
  0x4c   : > { %434 = dma.vmem_to_hbm [thread:$0]  (%p783_p8), %s282_s11, 256, %s284_s15, %s265_s16, %s699_s0, %s699_s0, %s700_s17  }
  0x4d PF: > { %s930_s19 = sld [smem:[#allocation16_spill]] }
  0x4e   : > { %s931_s22 = sld [smem:[#allocation14_spill]] }
  0x53   : > { %p456_p1 = scmp.ge.s32.totalorder %s930_s19, 2 }
  0x54   : > { %s298_s27 = sand.u32 1, %s931_s22  }
  0x55   : > { %p448_p2 = pnand %p456_p1, %p787_p9  ;;  %s299_s4 = scalar_lea.sflag [#allocation4], %s298_s27 }
  0x57   : > { %p449_p4 = pneg %p448_p2 }
  0x59   : > { %660 = dma.done.wait (%p449_p4), %s299_s4, 256  }
  0x5a   : > { %662 = vsyncadd (%p449_p4), %s299_s4, 4294967040  ;;  %s21_s19 = sadd.s32 1, %s930_s19   ;;  %s933_s8 = smov %s834_s12 }
  0x5b   : > { %p18_p5 = scmp.ge.s32.totalorder %s21_s19, 8   ;;  %s934_s15 = sld [smem:[#allocation15_spill]] }
  0x5c   : > { %s935_s17 = sld [smem:[#allocation18_spill]]  ;;  %s936_s12 = smov %s669_s13 }
  0x5d   : > { %s937_s13 = smov %s673_s14  ;;  %s938_s14 = smov %s933_s8 }
  0x5e   : > { %s939_s16 = smov %s689_s18  ;;  %s940_s18 = smov %s946_s20 }
  0x5f   :  { %20 = sbr.rel (!%p18_p5) target bundleno = 12 (0xc), region = 86 }
  0x64   :  { %305 = vsyncpa [#allocation3], 1 }
  0x65   :  { %307 = vsyncpa [#allocation3 + $0x1], 1 }
  0x66   :  { %308 = vsyncpa [#allocation4], 1 }
  0x67   :  { %310 = vsyncpa [#allocation4 + $0x1], 1 }
  0x68   :  { %311 = vsyncpa [#allocation5], 1 }
  0x69   :  { %313 = vsyncpa [#allocation5 + $0x1], 1 }
  0x6a   :  { %314 = vsyncpa [#allocation7], 1 }

</bundles_post_ra>
